<compile_context>
chip_gen: v6e
topology: v6e:2x2x1
jax: 0.10.0
libtpu: 0.0.40
codegen_flags: <defaults>
</compile_context>

<pallas_src>
import functools

import jax
import jax.numpy as jnp
from jax.experimental import pallas as pl
from jax.experimental.pallas import tpu as pltpu


def _round_up(x: int, m: int) -> int:
    return (x + m - 1) // m * m


def two_layer_kernel(x_ref, w1_ref, b1_ref, w2_ref, b2_ref, out_ref):
    # Hidden layer: x @ W1 (f32 accumulate) + b1, then clamp(min=0) == ReLU.
    h = jnp.dot(x_ref[...], w1_ref[...], preferred_element_type=jnp.float32)
    h = jnp.maximum(h + b1_ref[...], 0.0)          # (TN, Hp) + (1, Hp) broadcast
    # Output layer: h @ W2 (f32 accumulate) + b2.  h is cast to the weight dtype
    # (bf16) so the second matmul also runs at bf16 MXU throughput.
    y = jnp.dot(h.astype(w2_ref.dtype), w2_ref[...],
                preferred_element_type=jnp.float32)
    out_ref[...] = (y + b2_ref[...]).astype(out_ref.dtype)


@functools.partial(jax.jit, static_argnames=("block_n", "use_bf16"))
def two_layer_net(x, w1, b1, w2, b2, *, block_n=512, use_bf16=True):
    """Fused Linear -> ReLU -> Linear.

    x: (N, D_in) f32; w1: (D_in, H); b1: (H,); w2: (H, D_out); b2: (D_out,).
    Returns (N, D_out) f32.
    """
    N, D_in = x.shape
    H = w1.shape[1]
    D_out = w2.shape[1]

    # --- lane-dense padding of the hidden and output widths (multiples of 128) ---
    Hp = _round_up(H, 128)
    Dp = _round_up(D_out, 128)

    compute_dtype = jnp.bfloat16 if use_bf16 else x.dtype

    w1_p = jnp.zeros((D_in, Hp), compute_dtype).at[:, :H].set(w1.astype(compute_dtype))
    b1_p = jnp.zeros((1, Hp), jnp.float32).at[:, :H].set(b1.astype(jnp.float32))
    w2_p = jnp.zeros((Hp, Dp), compute_dtype).at[:H, :D_out].set(w2.astype(compute_dtype))
    b2_p = jnp.zeros((1, Dp), jnp.float32).at[:, :D_out].set(b2.astype(jnp.float32))

    # --- N tiling: TN rows per grid step, padded so the grid covers N exactly ---
    tn = min(block_n, _round_up(N, 8))
    tn = _round_up(tn, 8)
    n_pad = _round_up(N, tn)
    x_p = jnp.pad(x.astype(compute_dtype), ((0, n_pad - N), (0, 0)))

    grid = (n_pad // tn,)

    # VMEM budget: resident weights/biases + double-buffered x/out tiles + h tile.
    itm = jnp.dtype(compute_dtype).itemsize
    est = (D_in * Hp * itm + Hp * Dp * itm + (Hp + Dp) * 4       # resident params
           + 2 * tn * D_in * itm + 2 * tn * Dp * 4               # streamed x / out
           + tn * Hp * 4)                                        # hidden activation
    vmem_bytes = min(max(2 * est + (4 << 20), 16 << 20), 64 << 20)

    out_p = pl.pallas_call(
        two_layer_kernel,
        out_shape=jax.ShapeDtypeStruct((n_pad, Dp), jnp.float32),
        grid_spec=pl.GridSpec(
            grid=grid,
            in_specs=[
                pl.BlockSpec((tn, D_in), lambda i: (i, 0)),   # x tile (streamed)
                pl.BlockSpec((D_in, Hp), lambda i: (0, 0)),   # W1 (resident)
                pl.BlockSpec((1, Hp), lambda i: (0, 0)),      # b1 (resident)
                pl.BlockSpec((Hp, Dp), lambda i: (0, 0)),     # W2 (resident)
                pl.BlockSpec((1, Dp), lambda i: (0, 0)),      # b2 (resident)
            ],
            out_specs=pl.BlockSpec((tn, Dp), lambda i: (i, 0)),
        ),
        compiler_params=pltpu.CompilerParams(
            dimension_semantics=("parallel",),   # shard N tiles across TCs (v7x)
            vmem_limit_bytes=vmem_bytes,
        ),
    )(x_p, w1_p, b1_p, w2_p, b2_p)

    return out_p[:N, :D_out]


if __name__ == "__main__":
    # Small-but-tiled shapes consistent with the module: x = randn(N, D_in).
    N, D_in, H, D_out = 256, 64, 32, 16

    key = jax.random.PRNGKey(0)
    kx, kw1, kb1, kw2, kb2 = jax.random.split(key, 5)

    x = jax.random.normal(kx, (N, D_in), dtype=jnp.float32)

    # PyTorch-Linear-style init: U(-1/sqrt(fan_in), 1/sqrt(fan_in)).
    bound1 = 1.0 / jnp.sqrt(jnp.float32(D_in))
    w1 = jax.random.uniform(kw1, (D_in, H), jnp.float32, -bound1, bound1)
    b1 = jax.random.uniform(kb1, (H,), jnp.float32, -bound1, bound1)

    bound2 = 1.0 / jnp.sqrt(jnp.float32(H))
    w2 = jax.random.uniform(kw2, (H, D_out), jnp.float32, -bound2, bound2)
    b2 = jax.random.uniform(kb2, (D_out,), jnp.float32, -bound2, bound2)

    # block_n=128 -> grid=(2,): exercises N-tiling + resident weights + "parallel".
    y = two_layer_net(x, w1, b1, w2, b2, block_n=128, use_bf16=True)
    y = jax.block_until_ready(y)
    assert y.shape == (N, D_out)

    # Reference 1 (exact same numerics: bf16 inputs, f32 accumulate) — tight check.
    xb, w1b, w2b = (a.astype(jnp.bfloat16) for a in (x, w1, w2))
    h_ref = jnp.maximum(
        jnp.dot(xb, w1b, preferred_element_type=jnp.float32) + b1, 0.0)
    y_ref_bf16 = jnp.dot(h_ref.astype(jnp.bfloat16), w2b,
                         preferred_element_type=jnp.float32) + b2
    assert jnp.allclose(y, y_ref_bf16, atol=1e-4, rtol=1e-4), "mismatch vs bf16 reference"

    # Reference 2 (pure f32 PyTorch semantics) — loose check on bf16 rounding error.
    y_ref_f32 = jnp.maximum(x @ w1 + b1, 0.0) @ w2 + b2
    assert jnp.allclose(y, y_ref_f32, atol=1e-1, rtol=1e-1), "mismatch vs f32 reference"

    print("KERNEL_OK")
</pallas_src>

<mosaic_0001>
module attributes {stable_mosaic.version = 11 : i64} {
  func.func @two_layer_kernel(%arg0: i32, %arg1: memref<128x64xbf16, #tpu.memory_space<vmem>>, %arg2: memref<64x128xbf16, #tpu.memory_space<vmem>>, %arg3: memref<1x128xf32, #tpu.memory_space<vmem>>, %arg4: memref<128x128xbf16, #tpu.memory_space<vmem>>, %arg5: memref<1x128xf32, #tpu.memory_space<vmem>>, %arg6: memref<128x128xf32, #tpu.memory_space<vmem>>) attributes {dimension_semantics = [#tpu.dimension_semantics<parallel>], iteration_bounds = array<i64: 2>, scalar_prefetch = 0 : i64, scratch_operands = 0 : i64, tpu.core_type = #tpu.core_type<tc>, window_params = [{transform_indices = @transform_0, window_bounds = array<i64: 128, 64>}, {pipeline_mode = #tpu.pipeline_mode<synchronous>, transform_indices = @transform_1, window_bounds = array<i64: 64, 128>}, {pipeline_mode = #tpu.pipeline_mode<synchronous>, transform_indices = @transform_2, window_bounds = array<i64: 1, 128>}, {pipeline_mode = #tpu.pipeline_mode<synchronous>, transform_indices = @transform_3, window_bounds = array<i64: 128, 128>}, {pipeline_mode = #tpu.pipeline_mode<synchronous>, transform_indices = @transform_4, window_bounds = array<i64: 1, 128>}, {transform_indices = @transform_5, window_bounds = array<i64: 128, 128>}]} {
    %c0 = arith.constant 0 : index
    %c0_0 = arith.constant 0 : index
    %0 = vector.load %arg1[%c0, %c0_0] : memref<128x64xbf16, #tpu.memory_space<vmem>>, vector<128x64xbf16>
    %c0_1 = arith.constant 0 : index
    %c0_2 = arith.constant 0 : index
    %1 = vector.load %arg2[%c0_1, %c0_2] : memref<64x128xbf16, #tpu.memory_space<vmem>>, vector<64x128xbf16>
    %cst = arith.constant dense<0.000000e+00> : vector<128x128xf32>
    %2 = tpu.matmul %0, %1, %cst {dimension_numbers = #tpu.dot_dimension_numbers<[1], [0], [0], [1], [0, 0, 1, 1], [], []>} : vector<128x64xbf16>, vector<64x128xbf16>, vector<128x128xf32> -> vector<128x128xf32>
    %c0_3 = arith.constant 0 : index
    %c0_4 = arith.constant 0 : index
    %3 = vector.load %arg3[%c0_3, %c0_4] : memref<1x128xf32, #tpu.memory_space<vmem>>, vector<1x128xf32>
    %4 = vector.broadcast %3 : vector<1x128xf32> to vector<128x128xf32>
    %5 = arith.addf %2, %4 : vector<128x128xf32>
    %cst_5 = arith.constant 0.000000e+00 : f32
    %6 = vector.broadcast %cst_5 : f32 to vector<128x128xf32>
    %7 = arith.maximumf %5, %6 : vector<128x128xf32>
    %8 = arith.truncf %7 : vector<128x128xf32> to vector<128x128xbf16>
    %c0_6 = arith.constant 0 : index
    %c0_7 = arith.constant 0 : index
    %9 = vector.load %arg4[%c0_6, %c0_7] : memref<128x128xbf16, #tpu.memory_space<vmem>>, vector<128x128xbf16>
    %cst_8 = arith.constant dense<0.000000e+00> : vector<128x128xf32>
    %10 = tpu.matmul %8, %9, %cst_8 {dimension_numbers = #tpu.dot_dimension_numbers<[1], [0], [0], [1], [0, 0, 1, 1], [], []>} : vector<128x128xbf16>, vector<128x128xbf16>, vector<128x128xf32> -> vector<128x128xf32>
    %c0_9 = arith.constant 0 : index
    %c0_10 = arith.constant 0 : index
    %11 = vector.load %arg5[%c0_9, %c0_10] : memref<1x128xf32, #tpu.memory_space<vmem>>, vector<1x128xf32>
    %12 = vector.broadcast %11 : vector<1x128xf32> to vector<128x128xf32>
    %13 = arith.addf %10, %12 : vector<128x128xf32>
    %c0_11 = arith.constant 0 : index
    %c0_12 = arith.constant 0 : index
    %14 = vector.load %arg6[%c0_11, %c0_12] : memref<128x128xf32, #tpu.memory_space<vmem>>, vector<128x128xf32>
    tpu.vector_store %arg6[%c0_11, %c0_12], %13 {strides = array<i32>} : memref<128x128xf32, #tpu.memory_space<vmem>>, vector<128x128xf32>,
    return
  }
  func.func @transform_0(%arg0: i32) -> (i32, i32) {
    %c0_i32 = arith.constant 0 : i32
    %c0_i32_0 = arith.constant 0 : i32
    return %arg0, %c0_i32 : i32, i32
  }
  func.func @transform_1(%arg0: i32) -> (i32, i32) {
    %c0_i32 = arith.constant 0 : i32
    %c0_i32_0 = arith.constant 0 : i32
    %c0_i32_1 = arith.constant 0 : i32
    return %c0_i32, %c0_i32_0 : i32, i32
  }
  func.func @transform_2(%arg0: i32) -> (i32, i32) {
    %c0_i32 = arith.constant 0 : i32
    %c0_i32_0 = arith.constant 0 : i32
    %c0_i32_1 = arith.constant 0 : i32
    return %c0_i32, %c0_i32_0 : i32, i32
  }
  func.func @transform_3(%arg0: i32) -> (i32, i32) {
    %c0_i32 = arith.constant 0 : i32
    %c0_i32_0 = arith.constant 0 : i32
    %c0_i32_1 = arith.constant 0 : i32
    return %c0_i32, %c0_i32_0 : i32, i32
  }
  func.func @transform_4(%arg0: i32) -> (i32, i32) {
    %c0_i32 = arith.constant 0 : i32
    %c0_i32_0 = arith.constant 0 : i32
    %c0_i32_1 = arith.constant 0 : i32
    return %c0_i32, %c0_i32_0 : i32, i32
  }
  func.func @transform_5(%arg0: i32) -> (i32, i32) {
    %c0_i32 = arith.constant 0 : i32
    %c0_i32_0 = arith.constant 0 : i32
    return %arg0, %c0_i32 : i32, i32
  }
}

</mosaic_0001>

<bundles_post_ra>
// kernel: two_layer_net.1
= control target key start
LH: loop header
LB: loop body
LE: loop exit
PB: predicated region body
PF: predicated region fallthrough
CT: control target
= control target key end

     0   :  { %s917_s18 = smov 0   ;;  %s1016_s0 = inlined_call_operand.vmem [shape: bf16[256,64], index: 0, kind: input, shape index: {}]   ;;  %s1017_s1 = inlined_call_operand.vmem [shape: bf16[64,128], index: 1, kind: input, shape index: {}]   ;;  %s1018_s2 = inlined_call_operand.vmem [shape: f32[1,128], index: 2, kind: input, shape index: {}]   ;;  %s1019_s3 = inlined_call_operand.vmem [shape: bf16[128,128], index: 3, kind: input, shape index: {}]   ;;  %s1020_s4 = inlined_call_operand.vmem [shape: f32[1,128], index: 4, kind: input, shape index: {}]   ;;  %s1021_s5 = inlined_call_operand.vmem [shape: f32[256,128], index: 5, kind: output, shape index: {}]  }
   0x1 LB: > { %s710_s19 = sadd.s32 4294967295, %s885_s18   ;;  %p714_p0 = scmp.ge.s32.totalorder %s885_s18, 1  ;;  %s885_s18 = sphi %s917_s18, %s15_s18  }
   0x2   : > { %p188_p1 = scmp.lt.s32.totalorder %s885_s18, 3 }
   0x4   : > { %p189_p2 = pnand %p714_p0, %p188_p1 }
   0x5   : > { %s715_s22 = sshll.u32 (!%p189_p2), %s710_s19, 4 }
   0x6   : > { %192 = sbr.rel (%p189_p2) target bundleno = 460 (0x1cc), region = 40  ;;  %p217_p3 = scmp.lt.s32.totalorder (!%p189_p2), %s715_s22, 31 }
   0xb   : > { %v859_v0 = vld [vmem:[%s1017_s1 + $0x18] sm:$0xff]   ;;  %v860_v1 = vld [vmem:[%s1017_s1 + $0x10] sm:$0xff]   ;;  %v861_v2 = vld [vmem:[%s1017_s1 + $0x8] sm:$0xff]   ;;  %s1023_s22 = smov (!%p217_p3, %s715_s22), 31  ;;  %vm324_vm0 = vcmask 523264  }
   0xc   : > { %779 = vmatprep.subr.bf16.mxu0 %v859_v0  ;;  %v871_v3 = vld [vmem:[%s1019_s3 + $0x38] sm:$0xff]   ;;  %s716_s29 = sshll.u32 %s1023_s22, 2  ;;  %v872_v4 = vld [vmem:[%s1019_s3 + $0x30] sm:$0xff]   ;;  %v862_v6 = vld [vmem:[%s1017_s1] sm:$0xff]   ;;  %s718_s28 = sshll.u32 %s1023_s22, 3 }
   0xd   : > { %780 = vmatpush3.bf16.msra.mxu0 %v859_v0  ;;  %s943_s7 = scalar_lea.vmem %s1016_s0, %s716_s29  ;;  %835 = vmatprep.subr.bf16.mxu1 %v871_v3  ;;  %v873_v7 = vld [vmem:[%s1019_s3 + $0x28] sm:$0xff]   ;;  %v874_v10 = vld [vmem:[%s1019_s3 + $0x20] sm:$0xff]   ;;  %v875_v11 = vld [vmem:[%s1019_s3 + $0x18] sm:$0xff]   ;;  %s995_s8 = scalar_lea.vmem %s1021_s5, %s718_s28 }
   0xe   : > { %781 = vmatprep.subr.bf16.mxu0 %v860_v1  ;;  %v863_v5 = vld [vmem:[%s943_s7] sm:$0xff]   ;;  %843 = vmatpush3.bf16.msra.mxu1 %v871_v3  ;;  %v864_v8 = vld [vmem:[%s943_s7 + $0x8] sm:$0xff]   ;;  %v865_v9 = vld [vmem:[%s943_s7 + $0x10] sm:$0xff]  }
   0xf   : > { %836 = vmatprep.subr.bf16.mxu1 %v872_v4  ;;  %787 = vmatprep.mubr.msk.bf16.mxu0 %vm324_vm0, %v863_v5  ;;  %v866_v12 = vld [vmem:[%s943_s7 + $0x18] sm:$0xff]   ;;  %v867_v13 = vld [vmem:[%s943_s7 + $0x20] sm:$0xff]   ;;  %v868_v14 = vld [vmem:[%s943_s7 + $0x28] sm:$0xff]  }
  0x10   : > { %v869_v15 = vld [vmem:[%s943_s7 + $0x30] sm:$0xff]   ;;  %v870_v16 = vld [vmem:[%s943_s7 + $0x38] sm:$0xff]   ;;  %v877_v18 = vld [vmem:[%s1019_s3 + $0x8] sm:$0xff]  }
  0x11   : > { %782 = vmatpush3.bf16.msra.mxu0 %v860_v1  ;;  %v876_v17 = vld [vmem:[%s1019_s3 + $0x10] sm:$0xff]   ;;  %v878_v19 = vld [vmem:[%s1019_s3] sm:$0xff]  }
  0x12   : > { %783 = vmatprep.subr.bf16.mxu0 %v861_v2  ;;  %844 = vmatpush3.bf16.msra.mxu1 %v872_v4  ;;  %v719_v22 = vld [vmem:[%s1018_s2] ss:$0 sm:$0xff] }
  0x13   : > { %837 = vmatprep.subr.bf16.mxu1 %v873_v7 }
  0x15   : > { %784 = vmatpush3.bf16.msra.mxu0 %v861_v2 }
  0x16   : > { %785 = vmatprep.subr.bf16.mxu0 %v862_v6  ;;  %845 = vmatpush3.bf16.msra.mxu1 %v873_v7 }
  0x17   : > { %838 = vmatprep.subr.bf16.mxu1 %v874_v10 }
  0x19   : > { %786 = vmatpush3.bf16.msra.mxu0 %v862_v6 }
  0x1a   : > { %803 = vmatprep.subr.bf16.mxu0 %v871_v3  ;;  %846 = vmatpush3.bf16.msra.mxu1 %v874_v10 }
  0x1b   : > { %839 = vmatprep.subr.bf16.mxu1 %v875_v11 }
  0x1c   : > { %788 = vmatmul.mubr.msk.bf16.vlgmr.msra.gmra.mxu0 %vm324_vm0, %v864_v8 }
  0x1d   : > { %791 = vmatprep.mubr.msk.bf16.mxu0 %vm324_vm0, %v865_v9  ;;  %804 = vmatpush3.bf16.msra.mxu0 %v871_v3 }
  0x1e   : > { %805 = vmatprep.subr.bf16.mxu0 %v872_v4  ;;  %847 = vmatpush3.bf16.msra.mxu1 %v875_v11 }
  0x1f   : > { %840 = vmatprep.subr.bf16.mxu1 %v876_v17 }
  0x21   : > { %806 = vmatpush3.bf16.msra.mxu0 %v872_v4 }
  0x22   : > { %807 = vmatprep.subr.bf16.mxu0 %v873_v7  ;;  %848 = vmatpush3.bf16.msra.mxu1 %v876_v17 }
  0x23   : > { %841 = vmatprep.subr.bf16.mxu1 %v877_v18 }
  0x24   : > { %792 = vmatmul.mubr.msk.bf16.gmra.mxu0 %vm324_vm0, %v866_v12 }
  0x25   : > { %795 = vmatprep.mubr.msk.bf16.mxu0 %vm324_vm0, %v867_v13  ;;  %808 = vmatpush3.bf16.msra.mxu0 %v873_v7  ;;  %v740_v13 = vld [vmem:[%s1020_s4] ss:$0 sm:$0xff] }
  0x26   : > { %809 = vmatprep.subr.bf16.mxu0 %v874_v10  ;;  %849 = vmatpush3.bf16.msra.mxu1 %v877_v18 }
  0x27   : > { %842 = vmatprep.subr.bf16.mxu1 %v878_v19 }
  0x29   : > { %810 = vmatpush3.bf16.msra.mxu0 %v874_v10 }
  0x2a   : > { %811 = vmatprep.subr.bf16.mxu0 %v875_v11  ;;  %850 = vmatpush3.bf16.msra.mxu1 %v878_v19 }
  0x2c   : > { %796 = vmatmul.mubr.msk.bf16.gmra.mxu0 %vm324_vm0, %v868_v14 }
  0x2d   : > { %799 = vmatprep.mubr.msk.bf16.mxu0 %vm324_vm0, %v869_v15  ;;  %812 = vmatpush3.bf16.msra.mxu0 %v875_v11 }
  0x2e   : > { %813 = vmatprep.subr.bf16.mxu0 %v876_v17 }
  0x31   : > { %814 = vmatpush3.bf16.msra.mxu0 %v876_v17 }
  0x32   : > { %815 = vmatprep.subr.bf16.mxu0 %v877_v18 }
  0x34   : > { %800 = vmatmul.mubr.msk.bf16.gmra.mxu0 %vm324_vm0, %v870_v16 }
  0x35   : > { %816 = vmatpush3.bf16.msra.mxu0 %v877_v18 }
  0x36   : > { %817 = vmatprep.subr.bf16.mxu0 %v878_v19 }
  0x39   : > { %818 = vmatpush3.bf16.msra.mxu0 %v878_v19 }
  0xdc   : > { %v789_v20 = vpop.f32.mrf.mxu0 }
  0xdd   : > { %v392_v26 = vadd.f32 %v789_v20, %v719_v22 }
  0xde   : > { %v383_v21 = vpop.f32.mrf.mxu0 }
  0xdf   : > { %v384_v24 = vadd.f32 %v719_v22, %v383_v21  ;;  %v448_v33 = vmax.f32 %v392_v26, 0.0 }
  0xe0   : > { %v790_v23 = vpop.f32.mrf.mxu0 }
  0xe1   : > { %v395_v25 = vadd.f32 %v790_v23, %v719_v22  ;;  %v446_v31 = vmax.f32 %v384_v24, 0.0 }
  0xe2   : > { %v386_v27 = vpop.f32.mrf.mxu0 }
  0xe3   : > { %v387_v28 = vadd.f32 %v719_v22, %v386_v27  ;;  %v449_v29 = vmax.f32 %v395_v25, 0.0 }
  0xe4   : > { %v793_v30 = vpop.f32.mrf.mxu0 }
  0xe5   : > { %v447_v32 = vmax.f32 %v387_v28, 0.0  ;;  %v463_v36 = vpack.c.bf16 %v449_v29, %v448_v33  ;;  %v408_v40 = vadd.f32 %v793_v30, %v719_v22 }
  0xe6   : > { %v399_v34 = vpop.f32.mrf.mxu0 }
  0xe7   : > { %v462_v35 = vpack.c.bf16 %v447_v32, %v446_v31  ;;  %v400_v38 = vadd.f32 %v719_v22, %v399_v34  ;;  %v452_v47 = vmax.f32 %v408_v40, 0.0 }
  0xe8   : > { %v794_v37 = vpop.f32.mrf.mxu0 }
  0xe9   : > { %v411_v39 = vadd.f32 %v794_v37, %v719_v22  ;;  %819 = vmatprep.mubr.bf16.mxu0 %v462_v35  ;;  %v450_v45 = vmax.f32 %v400_v38, 0.0 }
  0xea   : > { %v402_v41 = vpop.f32.mrf.mxu0  ;;  %820 = vmatmul.mubr.bf16.vlgmr.msra.gmra.mxu0 %v463_v36 }
  0xeb   : > { %v403_v42 = vadd.f32 %v719_v22, %v402_v41  ;;  %v453_v43 = vmax.f32 %v411_v39, 0.0 }
  0xec   : > { %v797_v44 = vpop.f32.mrf.mxu0 }
  0xed   : > { %v451_v46 = vmax.f32 %v403_v42, 0.0  ;;  %v465_v50 = vpack.c.bf16 %v453_v43, %v452_v47  ;;  %v424_v54 = vadd.f32 %v797_v44, %v719_v22 }
  0xee   : > { %v415_v48 = vpop.f32.mrf.mxu0 }
  0xef   : > { %v464_v49 = vpack.c.bf16 %v451_v46, %v450_v45  ;;  %v416_v52 = vadd.f32 %v719_v22, %v415_v48  ;;  %v456_v61 = vmax.f32 %v424_v54, 0.0 }
  0xf0   : > { %v798_v51 = vpop.f32.mrf.mxu0 }
  0xf1   : > { %v427_v53 = vadd.f32 %v798_v51, %v719_v22  ;;  %823 = vmatprep.mubr.bf16.mxu1 %v464_v49  ;;  %v454_v59 = vmax.f32 %v416_v52, 0.0 }
  0xf2   : > { %v418_v55 = vpop.f32.mrf.mxu0  ;;  %824 = vmatmul.mubr.bf16.vlgmr.msra.gmra.mxu1 %v465_v50 }
  0xf3   : > { %v419_v56 = vadd.f32 %v719_v22, %v418_v55  ;;  %v457_v57 = vmax.f32 %v427_v53, 0.0 }
  0xf4   : > { %v801_v58 = vpop.f32.mrf.mxu0 }
  0xf5   : > { %v455_v60 = vmax.f32 %v419_v56, 0.0  ;;  %v467_v0 = vpack.c.bf16 %v457_v57, %v456_v61  ;;  %v440_v4 = vadd.f32 %v801_v58, %v719_v22 }
  0xf6   : > { %v431_v62 = vpop.f32.mrf.mxu0 }
  0xf7   : > { %v466_v63 = vpack.c.bf16 %v455_v60, %v454_v59  ;;  %v432_v2 = vadd.f32 %v719_v22, %v431_v62  ;;  %v460_v10 = vmax.f32 %v440_v4, 0.0 }
  0xf8   : > { %v802_v1 = vpop.f32.mrf.mxu0 }
  0xf9   : > { %v443_v3 = vadd.f32 %v802_v1, %v719_v22  ;;  %827 = vmatprep.mubr.bf16.mxu1 %v466_v63  ;;  %v458_v8 = vmax.f32 %v432_v2, 0.0 }
  0xfa   : > { %v434_v5 = vpop.f32.mrf.mxu0  ;;  %828 = vmatmul.mubr.bf16.gmra.mxu1 %v467_v0 }
  0xfb   : > { %v435_v6 = vadd.f32 %v719_v22, %v434_v5  ;;  %v461_v7 = vmax.f32 %v443_v3, 0.0 }
  0xfd   : > { %v459_v9 = vmax.f32 %v435_v6, 0.0  ;;  %v469_v12 = vpack.c.bf16 %v461_v7, %v460_v10 }
  0xff   : > { %v468_v11 = vpack.c.bf16 %v459_v9, %v458_v8 }
 0x101   : > { %831 = vmatprep.mubr.bf16.mxu1 %v468_v11 }
 0x102   : > { %832 = vmatmul.mubr.bf16.gmra.mxu1 %v469_v12 }
 0x1aa   : > { %v821_v14 = vpop.f32.mrf.mxu0 }
 0x1ab   : > { %v584_v15 = vadd.f32 %v821_v14, %v740_v13 }
 0x1ac   : > { %v575_v16 = vpop.f32.mrf.mxu0 }
 0x1ad   : > { %640 = vst [vmem:[%s995_s8 + $0x10] sm:$0xff] %v584_v15  ;;  %v576_v17 = vadd.f32 %v740_v13, %v575_v16 }
 0x1ae   : > { %v822_v18 = vpop.f32.mrf.mxu0 }
 0x1af   : > { %638 = vst [vmem:[%s995_s8] sm:$0xff] %v576_v17  ;;  %v587_v19 = vadd.f32 %v822_v18, %v740_v13 }
 0x1b0   : > { %v578_v20 = vpop.f32.mrf.mxu0 }
 0x1b1   : > { %641 = vst [vmem:[%s995_s8 + $0x18] sm:$0xff] %v587_v19  ;;  %v579_v21 = vadd.f32 %v740_v13, %v578_v20 }
 0x1b2   : > { %v825_v22 = vpop.f32.mrf.mxu1 }
 0x1b3   : > { %639 = vst [vmem:[%s995_s8 + $0x8] sm:$0xff] %v579_v21  ;;  %v600_v23 = vadd.f32 %v825_v22, %v740_v13 }
 0x1b4   : > { %v591_v24 = vpop.f32.mrf.mxu1 }
 0x1b5   : > { %644 = vst [vmem:[%s995_s8 + $0x30] sm:$0xff] %v600_v23  ;;  %v592_v25 = vadd.f32 %v740_v13, %v591_v24 }
 0x1b6   : > { %v826_v26 = vpop.f32.mrf.mxu1 }
 0x1b7   : > { %642 = vst [vmem:[%s995_s8 + $0x20] sm:$0xff] %v592_v25  ;;  %v603_v27 = vadd.f32 %v826_v26, %v740_v13 }
 0x1b8   : > { %v594_v28 = vpop.f32.mrf.mxu1 }
 0x1b9   : > { %645 = vst [vmem:[%s995_s8 + $0x38] sm:$0xff] %v603_v27  ;;  %v595_v29 = vadd.f32 %v740_v13, %v594_v28 }
 0x1ba   : > { %v829_v30 = vpop.f32.mrf.mxu1 }
 0x1bb   : > { %643 = vst [vmem:[%s995_s8 + $0x28] sm:$0xff] %v595_v29  ;;  %v616_v31 = vadd.f32 %v829_v30, %v740_v13 }
 0x1bc   : > { %v607_v32 = vpop.f32.mrf.mxu1 }
 0x1bd   : > { %648 = vst [vmem:[%s995_s8 + $0x50] sm:$0xff] %v616_v31  ;;  %v608_v33 = vadd.f32 %v740_v13, %v607_v32 }
 0x1be   : > { %v830_v34 = vpop.f32.mrf.mxu1 }
 0x1bf   : > { %646 = vst [vmem:[%s995_s8 + $0x40] sm:$0xff] %v608_v33  ;;  %v619_v35 = vadd.f32 %v830_v34, %v740_v13 }
 0x1c0   : > { %v610_v36 = vpop.f32.mrf.mxu1 }
 0x1c1   : > { %649 = vst [vmem:[%s995_s8 + $0x58] sm:$0xff] %v619_v35  ;;  %v611_v37 = vadd.f32 %v740_v13, %v610_v36 }
 0x1c2   : > { %v833_v38 = vpop.f32.mrf.mxu1 }
 0x1c3   : > { %647 = vst [vmem:[%s995_s8 + $0x48] sm:$0xff] %v611_v37  ;;  %v632_v39 = vadd.f32 %v833_v38, %v740_v13 }
 0x1c4   : > { %v623_v40 = vpop.f32.mrf.mxu1 }
 0x1c5   : > { %652 = vst [vmem:[%s995_s8 + $0x70] sm:$0xff] %v632_v39  ;;  %v624_v41 = vadd.f32 %v740_v13, %v623_v40 }
 0x1c6   : > { %v834_v42 = vpop.f32.mrf.mxu1 }
 0x1c7   : > { %650 = vst [vmem:[%s995_s8 + $0x60] sm:$0xff] %v624_v41  ;;  %v635_v43 = vadd.f32 %v834_v42, %v740_v13 }
 0x1c8   : > { %v626_v44 = vpop.f32.mrf.mxu1 }
 0x1c9   : > { %653 = vst [vmem:[%s995_s8 + $0x78] sm:$0xff] %v635_v43  ;;  %v627_v45 = vadd.f32 %v740_v13, %v626_v44 }
 0x1cb   : > { %651 = vst [vmem:[%s995_s8 + $0x68] sm:$0xff] %v627_v45 }
 0x1cc PF: > { %s15_s18 = sadd.s32 1, %s885_s18  }
 0x1cd   : > { %p12_p4 = scmp.ge.s32.totalorder %s15_s18, 4  }
 0x1cf   :  { %14 = sbr.rel (!%p12_p4) target bundleno = 1 (0x1), region = 70 }

</bundles_post_ra>
